<compile_context>
chip_gen: v7x
topology: tpu7x:2x2x1
jax: 0.10.0
libtpu: 0.0.40
codegen_flags: <defaults>
</compile_context>

<pallas_src>
import jax
import jax.numpy as jnp
from jax.experimental import pallas as pl
from jax.experimental.pallas import tpu as pltpu

EPS = 1e-8


def _round_up(a, m):
    return -(-a // m) * m


def tsk_kernel(lhs_ref, rhs_ref, rep_ref, red_ref, out_ref):
    R = rep_ref.shape[0]                      # n_rule (static)

    # ---- One fused MXU matmul: logits + per-rule consequent activations ----
    # m[:, :R]  = z logits ;  m[:, R:] = A'[n, r*C+c] = x@Wr + W2[r,c] + b[c]
    m = jnp.dot(lhs_ref[...], rhs_ref[...], preferred_element_type=jnp.float32)  # [TM, R+R*C]
    z = m[:, :R]                                                                  # [TM, R]
    a = m[:, R:]                                                                  # [TM, R*C]

    # ---- Softmax over rules (max-sub kept so padded rows stay finite) ----
    z = z - jnp.max(z, axis=-1, keepdims=True)
    e = jnp.exp(z)
    l = jnp.sum(e, axis=-1, keepdims=True)                                        # [TM, 1]
    r0 = pl.reciprocal(l, approx=True)          # EUP slot (free here)
    r0 = r0 * (2.0 - l * r0)                    # one Newton step -> f32-exact, negligible cost
    frs = e * r0                                                                  # [TM, R]

    # ---- Rule-weighted reduction via two tiny 0/1 matmuls (no [TM,R,C] relayout) ----
    frs_rep = jnp.dot(frs, rep_ref[...], preferred_element_type=jnp.float32)      # [TM, R*C]
    y = jnp.dot(a * frs_rep, red_ref[...], preferred_element_type=jnp.float32)    # [TM, C]

    # Single merged output block: [out | frs]
    out_ref[...] = jnp.concatenate([y, frs], axis=1)                              # [TM, C+R]


def tsk_forward(x, center, sigma, w_torch, bias, *, tm=1024):
    """First-order TSK forward.

    x: [N, D]; center/sigma: [D, R] (Gaussian antecedent); w_torch: [C, (D+1)*R]
    (PyTorch nn.Linear layout); bias: [C].  Returns (out [N, C], frs [N, R]).
    """
    N, D = x.shape
    R = center.shape[1]
    C = bias.shape[0]

    x = x.astype(jnp.float32)
    center = center.astype(jnp.float32)
    sigma = sigma.astype(jnp.float32)
    w_torch = w_torch.astype(jnp.float32)
    bias = bias.astype(jnp.float32)

    # Batch tile: large default (amortizes ~0.35us/step overhead), clamped so that
    # grid >= 2 whenever N allows (v7x megacore), multiple of 8 for sublane alignment.
    n8 = _round_up(N, 8)
    cap = max(8, _round_up(n8 // 2, 8)) if n8 >= 16 else n8
    tm = max(8, min(tm, cap))
    Np = _round_up(N, tm)

    xp = x if Np == N else jnp.pad(x, ((0, Np - N), (0, 0)))
    # LHS = [x, x^2, 1], precomputed lane-contiguous in the wrapper.
    lhs = jnp.concatenate([xp, xp * xp, jnp.ones((Np, 1), jnp.float32)], axis=1)   # [Np, 2D+1]

    # ---- Pack all grid-invariant constants into one fused RHS ----
    inv = 0.5 / (sigma * sigma + EPS)                                   # [D, R]
    cinv = center * inv                                                 # [D, R]
    c2 = jnp.sum(center * center * inv, axis=0, keepdims=True)          # [1, R]

    # Consequent: PyTorch Linear weight [C, (D+1)*R]; cons_input columns are
    # [x*frs rule-major (r, d), then frs].
    w1 = w_torch[:, :R * D].T.reshape(R, D, C)                          # w1[r, d, c]
    wr = jnp.transpose(w1, (1, 0, 2)).reshape(D, R * C)                 # wr[d, r*C + c]
    w2 = w_torch[:, R * D:].T                                           # [R, C]
    # sum_r frs = 1  =>  fold the output bias into every rule's constant term.
    w2b = (w2 + bias[None, :]).reshape(1, R * C)                        # [1, R*C]

    # rhs columns: [ z-logits (R) | per-rule consequent activations (R*C) ]
    # rhs rows   : [ x rows (D)   ; x^2 rows (D) ; ones row (1) ]
    rhs = jnp.concatenate([
        jnp.concatenate([2.0 * cinv, wr], axis=1),
        jnp.concatenate([-inv, jnp.zeros((D, R * C), jnp.float32)], axis=1),
        jnp.concatenate([-c2, w2b], axis=1),
    ], axis=0)                                                          # [2D+1, R+R*C]

    rep_mat = jnp.repeat(jnp.eye(R, dtype=jnp.float32), C, axis=1)      # [R, R*C]: frs -> frs_rep
    red_mat = jnp.tile(jnp.eye(C, dtype=jnp.float32), (R, 1))           # [R*C, C]: sum over rules

    packed = pl.pallas_call(
        tsk_kernel,
        out_shape=jax.ShapeDtypeStruct((Np, C + R), jnp.float32),
        grid=(Np // tm,),
        in_specs=[
            pl.BlockSpec((tm, 2 * D + 1), lambda i: (i, 0)),            # [x, x^2, 1] batch tile
            pl.BlockSpec((2 * D + 1, R + R * C), lambda i: (0, 0)),     # fused RHS   (resident)
            pl.BlockSpec((R, R * C), lambda i: (0, 0)),                 # repeat 0/1  (resident)
            pl.BlockSpec((R * C, C), lambda i: (0, 0)),                 # reduce 0/1  (resident)
        ],
        out_specs=pl.BlockSpec((tm, C + R), lambda i: (i, 0)),          # merged [out | frs]
        compiler_params=pltpu.CompilerParams(dimension_semantics=("parallel",)),
    )(lhs, rhs, rep_mat, red_mat)

    return packed[:N, :C], packed[:N, C:]


def tsk_reference(x, center, sigma, w_torch, bias):
    """Pure-JAX mirror of the PyTorch forward (order=1, get_frs=True)."""
    N, D = x.shape
    R = center.shape[1]
    z = -jnp.sum((x[:, :, None] - center[None]) ** 2
                 * (0.5 / (sigma ** 2 + EPS))[None], axis=1)
    frs = jax.nn.softmax(z, axis=-1)
    xr = (x[:, None, :] * frs[:, :, None]).reshape(N, R * D)
    cons_in = jnp.concatenate([xr, frs], axis=1)
    out = cons_in @ w_torch.T + bias
    return out, frs


if __name__ == "__main__":
    N, D, R, C = 16, 16, 8, 4          # batch, in_dim, n_rule, out_dim
    key = jax.random.PRNGKey(0)
    k0, k1, k2, k3, k4 = jax.random.split(key, 5)

    x = jax.random.normal(k0, (N, D), jnp.float32)
    # Antecedent (Gaussian MF) parameters, deterministic.
    center = jax.random.normal(k1, (D, R), jnp.float32)
    sigma = 1.0 + 0.1 * jax.random.normal(k2, (D, R), jnp.float32)
    # Consequent Linear((D+1)*R, C) parameters, PyTorch layout, deterministic uniform init.
    fan_in = (D + 1) * R
    bound = 1.0 / float(jnp.sqrt(fan_in))
    w_torch = jax.random.uniform(k3, (C, fan_in), jnp.float32, -bound, bound)
    bias = jax.random.uniform(k4, (C,), jnp.float32, -bound, bound)

    out, frs = tsk_forward(x, center, sigma, w_torch, bias)
    jax.block_until_ready((out, frs))

    ref_out, ref_frs = tsk_reference(x, center, sigma, w_torch, bias)
    assert out.shape == (N, C) and frs.shape == (N, R)
    # Slightly relaxed tolerances: the fused expanded-quadratic antecedent changes rounding.
    assert jnp.allclose(frs, ref_frs, atol=2e-4, rtol=2e-4)
    assert jnp.allclose(out, ref_out, atol=1e-3, rtol=1e-3)
    print("KERNEL_OK")
</pallas_src>

<mosaic_0001>
module attributes {stable_mosaic.version = 11 : i64} {
  func.func @tsk_kernel(%arg0: i32, %arg1: memref<8x33xf32, #tpu.memory_space<vmem>>, %arg2: memref<33x40xf32, #tpu.memory_space<vmem>>, %arg3: memref<8x32xf32, #tpu.memory_space<vmem>>, %arg4: memref<32x4xf32, #tpu.memory_space<vmem>>, %arg5: memref<8x12xf32, #tpu.memory_space<vmem>>) attributes {dimension_semantics = [#tpu.dimension_semantics<parallel>], iteration_bounds = array<i64: 2>, scalar_prefetch = 0 : i64, scratch_operands = 0 : i64, tpu.core_type = #tpu.core_type<tc>, window_params = [{transform_indices = @transform_0, window_bounds = array<i64: 8, 33>}, {pipeline_mode = #tpu.pipeline_mode<synchronous>, transform_indices = @transform_1, window_bounds = array<i64: 33, 40>}, {pipeline_mode = #tpu.pipeline_mode<synchronous>, transform_indices = @transform_2, window_bounds = array<i64: 8, 32>}, {pipeline_mode = #tpu.pipeline_mode<synchronous>, transform_indices = @transform_3, window_bounds = array<i64: 32, 4>}, {transform_indices = @transform_4, window_bounds = array<i64: 8, 12>}]} {
    %c0 = arith.constant 0 : index
    %c0_0 = arith.constant 0 : index
    %0 = vector.load %arg1[%c0, %c0_0] : memref<8x33xf32, #tpu.memory_space<vmem>>, vector<8x33xf32>
    %c0_1 = arith.constant 0 : index
    %c0_2 = arith.constant 0 : index
    %1 = vector.load %arg2[%c0_1, %c0_2] : memref<33x40xf32, #tpu.memory_space<vmem>>, vector<33x40xf32>
    %cst = arith.constant dense<0.000000e+00> : vector<8x40xf32>
    %2 = tpu.matmul %0, %1, %cst {dimension_numbers = #tpu.dot_dimension_numbers<[1], [0], [0], [1], [0, 0, 1, 1], [], []>} : vector<8x33xf32>, vector<33x40xf32>, vector<8x40xf32> -> vector<8x40xf32>
    %3 = vector.extract_strided_slice %2 {offsets = [0, 0], sizes = [8, 8], strides = [1, 1]} : vector<8x40xf32> to vector<8x8xf32>
    %4 = vector.extract_strided_slice %2 {offsets = [0, 8], sizes = [8, 32], strides = [1, 1]} : vector<8x40xf32> to vector<8x32xf32>
    %cst_3 = arith.constant dense<0xFF800000> : vector<8xf32>
    %5 = vector.multi_reduction <maximumf>, %3, %cst_3 [1] : vector<8x8xf32> to vector<8xf32>
    %6 = vector.shape_cast %5 : vector<8xf32> to vector<8x1xf32>
    %7 = vector.broadcast %6 : vector<8x1xf32> to vector<8x8xf32>
    %8 = arith.subf %3, %7 : vector<8x8xf32>
    %9 = math.exp %8 : vector<8x8xf32>
    %cst_4 = arith.constant dense<0.000000e+00> : vector<8xf32>
    %10 = vector.multi_reduction <add>, %9, %cst_4 [1] : vector<8x8xf32> to vector<8xf32>
    %11 = vector.shape_cast %10 : vector<8xf32> to vector<8x1xf32>
    %12 = tpu.reciprocal %11 {approx = true} : vector<8x1xf32> -> vector<8x1xf32>
    %13 = arith.mulf %11, %12 : vector<8x1xf32>
    %cst_5 = arith.constant 2.000000e+00 : f32
    %14 = vector.broadcast %cst_5 : f32 to vector<8x1xf32>
    %15 = arith.subf %14, %13 : vector<8x1xf32>
    %16 = arith.mulf %12, %15 : vector<8x1xf32>
    %17 = vector.broadcast %16 : vector<8x1xf32> to vector<8x8xf32>
    %18 = arith.mulf %9, %17 : vector<8x8xf32>
    %c0_6 = arith.constant 0 : index
    %c0_7 = arith.constant 0 : index
    %19 = vector.load %arg3[%c0_6, %c0_7] : memref<8x32xf32, #tpu.memory_space<vmem>>, vector<8x32xf32>
    %cst_8 = arith.constant dense<0.000000e+00> : vector<8x32xf32>
    %20 = tpu.matmul %18, %19, %cst_8 {dimension_numbers = #tpu.dot_dimension_numbers<[1], [0], [0], [1], [0, 0, 1, 1], [], []>} : vector<8x8xf32>, vector<8x32xf32>, vector<8x32xf32> -> vector<8x32xf32>
    %21 = arith.mulf %4, %20 : vector<8x32xf32>
    %c0_9 = arith.constant 0 : index
    %c0_10 = arith.constant 0 : index
    %22 = vector.load %arg4[%c0_9, %c0_10] : memref<32x4xf32, #tpu.memory_space<vmem>>, vector<32x4xf32>
    %cst_11 = arith.constant dense<0.000000e+00> : vector<8x4xf32>
    %23 = tpu.matmul %21, %22, %cst_11 {dimension_numbers = #tpu.dot_dimension_numbers<[1], [0], [0], [1], [0, 0, 1, 1], [], []>} : vector<8x32xf32>, vector<32x4xf32>, vector<8x4xf32> -> vector<8x4xf32>
    %24 = tpu.concatenate %23, %18 in 1 : vector<8x4xf32>, vector<8x8xf32> -> vector<8x12xf32>
    %c0_12 = arith.constant 0 : index
    %c0_13 = arith.constant 0 : index
    %25 = vector.load %arg5[%c0_12, %c0_13] : memref<8x12xf32, #tpu.memory_space<vmem>>, vector<8x12xf32>
    tpu.vector_store %arg5[%c0_12, %c0_13], %24 {strides = array<i32>} : memref<8x12xf32, #tpu.memory_space<vmem>>, vector<8x12xf32>,
    return
  }
  func.func @transform_0(%arg0: i32) -> (i32, i32) {
    %c0_i32 = arith.constant 0 : i32
    %c0_i32_0 = arith.constant 0 : i32
    return %arg0, %c0_i32 : i32, i32
  }
  func.func @transform_1(%arg0: i32) -> (i32, i32) {
    %c0_i32 = arith.constant 0 : i32
    %c0_i32_0 = arith.constant 0 : i32
    %c0_i32_1 = arith.constant 0 : i32
    return %c0_i32, %c0_i32_0 : i32, i32
  }
  func.func @transform_2(%arg0: i32) -> (i32, i32) {
    %c0_i32 = arith.constant 0 : i32
    %c0_i32_0 = arith.constant 0 : i32
    %c0_i32_1 = arith.constant 0 : i32
    return %c0_i32, %c0_i32_0 : i32, i32
  }
  func.func @transform_3(%arg0: i32) -> (i32, i32) {
    %c0_i32 = arith.constant 0 : i32
    %c0_i32_0 = arith.constant 0 : i32
    %c0_i32_1 = arith.constant 0 : i32
    return %c0_i32, %c0_i32_0 : i32, i32
  }
  func.func @transform_4(%arg0: i32) -> (i32, i32) {
    %c0_i32 = arith.constant 0 : i32
    %c0_i32_0 = arith.constant 0 : i32
    return %arg0, %c0_i32 : i32, i32
  }
}

</mosaic_0001>

<bundles_post_ra>
// kernel: tpu_custom_call.1
= control target key start
LH: loop header
LB: loop body
LE: loop exit
PB: predicated region body
PF: predicated region fallthrough
CT: control target
= control target key end

     0   :  { %9 = vsyncpa [#allocation3], 0  ;;  %s977_s0 = inlined_call_operand.vmem [shape: f32[16,33], index: 0, kind: input, shape index: {}]   ;;  %s978_s1 = inlined_call_operand.hbm [shape: f32[33,40], index: 1, kind: input, shape index: {}]   ;;  %s979_s2 = inlined_call_operand.vmem [shape: f32[8,32], index: 2, kind: input, shape index: {}]   ;;  %s980_s3 = inlined_call_operand.vmem [shape: f32[32,4], index: 3, kind: input, shape index: {}]   ;;  %s981_s4 = inlined_call_operand.hbm [shape: f32[16,12], index: 4, kind: output, shape index: {}]  }
   0x1   :  { %10 = vsyncpa [#allocation4], 0 }
   0x2   :  { %12 = vsyncpa [#allocation4 + $0x1], 0  ;;  %s821_s15 = smov 0   ;;  %s823_s16 = smov 0  }
   0x3   :  { %s825_s17 = smov 0   ;;  %s827_s18 = smov 0  }
   0x4 LB: > { %s842_s19 = sadd.s32 4294967295, %s784_s18   ;;  %s558_s20 = sadd.s32 4294967294, %s784_s18   ;;  %s784_s18 = sphi %s827_s18, %s997_s18   ;;  %s780_s17 = sphi %s825_s17, %s996_s17   ;;  %s776_s16 = sphi %s823_s16, %s995_s16   ;;  %s772_s15 = sphi %s821_s15, %s994_s15  }
   0x5   : > { %s846_s21 = sadd.s32 1, %s784_s18   ;;  %s114_s22 = sadd.s32 1, %s780_s17 }
   0x6   : > { %s111_s23 = ssub.s32 %s784_s18, %s846_s21  ;;  %p124_p0 = scmp.ne.s32.totalorder %s780_s17, %s776_s16 }
   0x7   : > { %p112_p1 = scmp.eq.s32.totalorder %s111_s23, 0  ;;  %p125_p2 = scmp.eq.s32.totalorder %s842_s19, 1 }
   0x8   : > { %p130_p3 = scmp.ne.s32.totalorder %s776_s16, %s772_s15  ;;  %p131_p4 = scmp.eq.s32.totalorder %s558_s20, 1 }
   0x9   : > { %s857_s24 = scalar_select %p112_p1, %s780_s17, %s114_s22  }
   0xa   : > { %p859_p5 = por %p125_p2, %p124_p0  ;;  %p863_p6 = por %p131_p4, %p130_p3 }
   0xb   : > { %p559_p7 = scmp.ge.s32.totalorder %s784_s18, 1  ;;  %p138_p8 = scmp.lt.s32.totalorder %s784_s18, 3 }
   0xc   : > { %s985_s25 = scalar_select %p859_p5, 1, 0 }
   0xd   : > { %s986_s26 = scalar_select %p863_p6, 1, 0 }
   0xe   : > { %p982_p9 = scmp.eq.s32.totalorder %s842_s19, 0  ;;  %p870_p10 = pnand %p559_p7, %p138_p8 }
   0xf   : > { %s786_s28 = smov [#allocation2]   ;;  %s690_s7 = scalar_lea.hbm %s978_s1, 640 }
  0x10   : > { %s987_s27 = scalar_select %p870_p10, 1, 0 }
  0x11   : > { %s150_s29 = sshll.u32 %s786_s28, 4  ;;  %p634_p11 = pneg %p870_p10  ;;  %s151_s29 = int_to_ptr.vmem [resolvable:$true] %s150_s29 }
  0x12   : > { %p691_p13 = scmp.ne.s32.totalorder %s978_s1, %s690_s7  ;;  %p697_p3 = scmp.lt.u32.totalorder %s690_s7, %s978_s1 }
  0x13   : > { %p878_p12 = pnand %p982_p9, %p634_p11 }
  0x15   : > { %p692_p0 = pneg %p878_p12 }
  0x17   : > { %p693_p1 = pnand %p692_p0, %p691_p13 }
  0x19   : > { %p694_p2 = pneg %p693_p1 }
  0x1b   : > { %p699_p4 = pnand %p697_p3, %p694_p2 }
  0x1d   : > { %702 = shalt.err (!%p699_p4)
}
  0x1e   : > { %s703_s12 = scalar_lea.vmem %s151_s29, 640  ;;  %p711_p9 = scmp.lt.s32.totalorder %s151_s29, %s151_s29 }
  0x1f   : > { %p704_p7 = scmp.ne.s32.totalorder %s151_s29, %s703_s12  ;;  %p712_p6 = scmp.lt.s32.totalorder %s703_s12, %s703_s12 }
  0x21   : > { %p706_p8 = pnand %p704_p7, %p692_p0  ;;  %p713_p5 = por %p712_p6, %p711_p9 }
  0x23   : > { %p707_p11 = pneg %p706_p8 }
  0x25   : > { %p714_p10 = pnand %p713_p5, %p707_p11 }
  0x27   : > { %717 = shalt.err (!%p714_p10)
}
  0x28   : > { %s787_s13 = smov 128   ;;  %s788_s14 = smov 8  }
  0x29   : > { %637 = dma.hbm_to_vmem [thread:$0]  (!%p878_p12), %s978_s1, 640, %s151_s29, [#allocation3], %s787_s13, %s787_s13, %s788_s14  }
  0x2a   : > { %p989_p13 = scmp.ne.s32.totalorder %s987_s27, 0 }
  0x2b   : > { %p990_p1 = scmp.eq.s32.totalorder (!%p989_p13), %s842_s19, 0 }
  0x2c   : > { %179 = sbr.rel (%p989_p13) target bundleno = 1267 (0x4f3), region = 36 }
  0x33   : > { %763 = dma.done.wait (%p990_p1), [#allocation3], 640   ;;  %p991_p0 = pmov %p990_p1 }
  0x34   : > { %v789_v0 = vmov 0.0|0.0   ;;  %vm790_vm0 = vmmov 0   ;;  %v791_v1 = vmov 0.0   ;;  %p204_p5 = scmp.lt.s32.totalorder %s842_s19, 1  ;;  %v209_v2 = vld [vmem:[#allocation2] sm:$0xff]  ;;  %v210_v3 = vld [vmem:[#allocation2 + $0x8] sm:$0xff] }
  0x35   : > { %765 = vsyncadd (%p991_p0), [#allocation3], 4294966656  ;;  %616 = vmatprep.subr.bf16.mxu0 %v789_v0  ;;  %597 = vmatprep.mubr.msk.f32.mxu0 %vm790_vm0, %v791_v1  ;;  %v211_v4 = vld [vmem:[#allocation2 + $0x10] sm:$0xff]  ;;  %v617_v5 = vpack.c.bf16 %v210_v3, %v209_v2  ;;  %v212_v6 = vld [vmem:[#allocation2 + $0x18] sm:$0xff]  ;;  %vm218_vm1 = vcmask 1040384   ;;  %vm214_vm2 = vcmask 269312  }
  0x36   : > { %600 = vmatprep.subr.mxu1 %v791_v1  ;;  %602 = vmatprep.mubr.msk.f32.mxu1 %vm790_vm0, %v791_v1  ;;  %s205_s23 = scalar_select %p204_p5, %s842_s19, 1  ;;  %v620_v7 = vpack.c.bf16 %v212_v6, %v211_v4  ;;  %v213_v8 = vld [vmem:[#allocation2 + $0x20] sm:$0x1]  ;;  %vm292_vm3 = vcmask 64512   ;;  %v387_v26 = vld [vmem:[%s980_s3 + $0x8] sm:$0xff]  ;;  %v388_v27 = vld [vmem:[%s980_s3 + $0x10] sm:$0xff] }
  0x37   : > { %618 = vmatpush3.bf16.msra.mxu0 %v617_v5  ;;  %v307_v18 = vld [vmem:[%s979_s2] sm:$0xff]  ;;  %s792_s7 = smov 4   ;;  %v389_v29 = vld [vmem:[%s980_s3 + $0x18] sm:$0xff]  ;;  %s793_s22 = smov 8   ;;  %vm393_vm4 = vcmask 261120   ;;  %vm469_vm5 = vcmask 31744  }
  0x38   : > { %s565_s27 = sshll.u32 %s205_s23, 3  ;;  %619 = vmatprep.subr.bf16.mxu0 %v789_v0  ;;  %601 = vmatpush3.msra.mxu1 %v307_v18  ;;  %v386_v25 = vld [vmem:[%s980_s3] sm:$0xff]  ;;  %v626_v30 = vpack.c.bf16 %v389_v29, %v388_v27  ;;  %s794_s23 = smov 120   ;;  %vm471_vm6 = vcmask 97280  }
  0x39   : > { %s207_s30 = scalar_lea.vmem %s977_s0, %s565_s27  ;;  %622 = vmatprep.subr.bf16.mxu1 %v789_v0  ;;  %v623_v28 = vpack.c.bf16 %v387_v26, %v386_v25  ;;  %s201_s27 = sand.u32 1, %s776_s16  }
  0x3a   : > { %v208_v9 = vld [vmem:[%s207_s30] sm:$0xff]  ;;  %s564_s28 = sshll.u32 %s201_s27, 3  ;;  %s571_s29 = sshll.u32 %s842_s19, 7 }
  0x3b   : > { %621 = vmatpush3.bf16.msra.mxu0 %v620_v7  ;;  %s203_s30 = scalar_lea.vmem [#allocation5], %s564_s28  ;;  %s935_s8 = scalar_lea.hbm %s981_s4, %s571_s29 }
  0x3c   : > { %595 = vmatprep.subr.mxu0 %v791_v1  ;;  %s487_s5 = sshll.u32 %s203_s30, 4  ;;  %s474_s19 = scalar_lea.sflag [#allocation4], %s201_s27  ;;  %s937_s5 = int_to_ptr.vmem [resolvable:$true] %s487_s5 }
  0x3d   : > { %s718_s9 = scalar_lea.vmem %s937_s5, 128  ;;  %p992_p9 = scmp.ne.s32.totalorder %s985_s25, 0 }
  0x3e   : > { %p719_p6 = scmp.ne.s32.totalorder %s937_s5, %s718_s9  ;;  %s795_s10 = smov [#allocation5]  }
  0x3f   : > { %596 = vmatpush3.msk.msra.mxu0 %vm218_vm1, %v213_v8  ;;  %s722_s11 = sshll.u32 %s795_s10, 4  ;;  %s723_s11 = int_to_ptr.vmem [resolvable:$false] %s722_s11 }
  0x40   : > { %598 = vmatmul.mubr.msk.f32.vlgmr.msra.gmra.mrb[0].mxu0 %vm214_vm2, %v208_v9  ;;  %p720_p10 = pnand %p719_p6, %p992_p9  ;;  %s724_s12 = scalar_lea.vmem %s723_s11, 256 }
  0x41   : > { %p725_p2 = scmp.lt.s32.totalorder %s937_s5, %s723_s11  ;;  %p726_p3 = scmp.lt.s32.totalorder %s724_s12, %s718_s9 }
  0x42   : > { %p721_p12 = pneg %p720_p10 }
  0x43   : > { %p727_p4 = por %p726_p3, %p725_p2 }
  0x45   : > { %p728_p7 = pnand %p727_p4, %p721_p12 }
 0x113   : > { %v288_v10 = vpop.f32.mrb[0].mxu0 }
 0x114   : > { %v599_v11 = vpop.f32.mrb[1].mxu0  ;;  %v293_v12 = vsel %vm292_vm3, %v288_v10, -inf }
 0x115   : > { %294 = vmax.xlane.f32.xlu0 %v293_v12 }
 0x1a2   : > { %v295_v13 = vpop.xlane.xlu0 %294 }
 0x1a3   : > { %v296_v14 = vsub.f32 %v288_v10, %v295_v13 }
 0x1a5   : > { %v297_v15 = vmul.f32 1.442695, %v296_v14 }
 0x1a7   : > { %686 = vpow2.f32 %v297_v15 }
 0x1b1   : > { %v687_v16 = vpop.eup %686 }
 0x1b2   : > { %v299_v17 = vsel %vm292_vm3, %v687_v16, 0.0 }
 0x1b3   : > { %300 = vadd.xlane.f32.xlu0 %v299_v17 }
 0x240   : > { %v301_v19 = vpop.xlane.xlu0 %300 }
 0x241   : > { %688 = vrcp.f32 %v301_v19 }
 0x24b   : > { %v689_v20 = vpop.eup %688 }
 0x24c   : > { %v303_v21 = vmul.f32 %v689_v20, %v301_v19 }
 0x24e   : > { %v304_v22 = vsub.f32 2.0, %v303_v21 }
 0x250   : > { %v305_v23 = vmul.f32 %v689_v20, %v304_v22 }
 0x252   : > { %v306_v24 = vmul.f32 %v687_v16, %v305_v23 }
 0x254   : > { %466 = vrot.lane.b32.xlu0 %v306_v24, %s792_s7  ;;  %603 = vmatmul.mubr.msk.f32.vlgmr.msra.gmra.mrb[0].mxu1 %vm292_vm3, %v306_v24 }
 0x255   : > { %613 = vmatprep.mubr.msk.f32.mxu1 %vm790_vm0, %v791_v1  ;;  %624 = vmatpush3.bf16.msra.mxu1 %v623_v28 }
 0x256   : > { %625 = vmatprep.subr.bf16.mxu1 %v789_v0 }
 0x259   : > { %627 = vmatpush3.bf16.msra.mxu1 %v626_v30 }
 0x2c6   : > { %v467_v36 = vpop.permute.xlu0 %466 }
 0x327   : > { %v377_v31 = vpop.f32.mrb[0].mxu1 }
 0x328   : > { %382 = vrot.lane.b32.xlu1 %v377_v31, %s793_s22  ;;  %v604_v32 = vpop.f32.mrb[1].mxu1 }
 0x39a   : > { %v383_v33 = vpop.permute.xlu1 %382 }
 0x39b   : > { %v385_v34 = vmul.f32 %v383_v33, %v288_v10 }
 0x39d   : > { %391 = vrot.lane.b32.xlu1 %v385_v34, %s794_s23 }
 0x40f   : > { %v392_v35 = vpop.permute.xlu1 %391 }
 0x410   : > { %614 = vmatmul.mubr.msk.f32.vlgmr.msra.gmra.mrb[2].mxu1 %vm393_vm4, %v392_v35 }
 0x4e3   : > { %v462_v37 = vpop.f32.mrb[2].mxu1 }
 0x4e4   : > { %v470_v38 = vsel %vm469_vm5, %v462_v37, %v467_v36  ;;  %v615_v39 = vpop.f32.mrb[3].mxu1 }
 0x4e5   : > { %472 = vst.msk [vmem:[%s203_s30] sm:$0xff] %vm471_vm6, %v470_v38 }
 0x4e6   : > { %731 = shalt.err (!%p728_p7)
}
 0x4e7   : > { %s732_s13 = scalar_lea.hbm %s935_s8, 128  ;;  %s736_s22 = scalar_lea.hbm %s981_s4, 256 }
 0x4e8   : > { %p733_p8 = scmp.ne.s32.totalorder %s935_s8, %s732_s13  ;;  %p737_p1 = scmp.lt.u32.totalorder %s935_s8, %s981_s4 }
 0x4e9   : > { %p738_p0 = scmp.lt.u32.totalorder %s736_s22, %s732_s13  ;;  %p740_p6 = scmp.lt.u32.totalorder %s732_s13, %s935_s8 }
 0x4ea   : > { %p734_p11 = pnand %p733_p8, %p992_p9 }
 0x4eb   : > { %p739_p5 = por %p738_p0, %p737_p1 }
 0x4ec   : > { %p735_p13 = pneg %p734_p11 }
 0x4ed   : > { %p741_p10 = por %p740_p6, %p739_p5 }
 0x4ef   : > { %p742_p12 = pnand %p741_p10, %p735_p13 }
 0x4f1   : > { %745 = shalt.err (!%p742_p12)
}
 0x4f2   : > { %632 = dma.vmem_to_hbm [thread:$0]  (%p992_p9), %s937_s5, 128, %s935_s8, %s474_s19  }
 0x4f3 PF: > { %p644_p2 = scmp.ge.s32.totalorder %s784_s18, 2  ;;  %s499_s28 = sand.u32 1, %s772_s15  }
 0x4f4   : > { %p993_p3 = scmp.ne.s32.totalorder %s986_s26, 0  ;;  %s500_s29 = scalar_lea.sflag [#allocation4], %s499_s28 }
 0x4f6   : > { %p639_p4 = pnand %p644_p2, %p993_p3 }
 0x4f8   : > { %767 = dma.done.wait (!%p639_p4), %s500_s29, 128  }
 0x4f9   : > { %769 = vsyncadd (!%p639_p4), %s500_s29, 4294967168  ;;  %p15_p7 = scmp.ge.s32.totalorder %s846_s21, 4   ;;  %s994_s15 = smov %s776_s16 }
 0x4fa   : > { %s995_s16 = smov %s780_s17  ;;  %s996_s17 = smov %s857_s24 }
 0x4fb   : > { %s997_s18 = smov %s846_s21  ;;  %17 = sbr.rel (!%p15_p7) target bundleno = 4 (0x4), region = 76 }
 0x502   :  { %505 = vsyncpa [#allocation3], 1 }
 0x503   :  { %507 = vsyncpa [#allocation3 + $0x1], 1 }
 0x504   :  { %508 = vsyncpa [#allocation4], 1 }
 0x505   :  { %510 = vsyncpa [#allocation4 + $0x1], 1 }

</bundles_post_ra>
